<compile_context>
chip_gen: v7x
topology: tpu7x:2x2x1
jax: 0.10.0
libtpu: 0.0.40
codegen_flags: <defaults>
</compile_context>

<pallas_src>
import functools

import jax
import jax.numpy as jnp
from jax.experimental import pallas as pl
from jax.experimental.pallas import tpu as pltpu

DROP_P = 0.8
KEEP_P = 0.2
KEEP_SCALE = 5.0  # 1 / KEEP_P
# keep iff hash_bits (uint32) < KEEP_P * 2^32
_KEEP_THRESHOLD_U32 = int(KEEP_P * (2 ** 32))  # 858993459

_LANE = 128


def value_net_kernel(seed_ref, xt_ref, w1_ref, b1_ref, w2_ref, b2_ref, o_ref):
    H = b1_ref.shape[0]
    TB = xt_ref.shape[1]

    # fc1 on the MXU: (H, In) bf16 x (In, TB) bf16 -> (H, TB) f32.
    # Standard contraction dims (no rhs transpose needed); batch lives on lanes.
    h = jnp.dot(w1_ref[...], xt_ref[...], preferred_element_type=jnp.float32)
    h = h + b1_ref[...]  # (H, 1) column broadcast across the batch lanes

    # Dropout(p=0.8), training mode: keep with prob 0.2, scale survivors by 5.
    # Counter-based PRNG: unique per-element index hashed with the seed
    # (murmur3 fmix32). Pure VPU integer ops; works on Mosaic and in interpret mode.
    rows = jax.lax.broadcasted_iota(jnp.int32, (H, TB), 0)
    cols = jax.lax.broadcasted_iota(jnp.int32, (H, TB), 1) + pl.program_id(0) * TB
    idx = (cols * H + rows).astype(jnp.uint32)          # unique per element
    u = idx + seed_ref[0].astype(jnp.uint32) * jnp.uint32(0x9E3779B9)
    u = (u ^ (u >> 16)) * jnp.uint32(0x85EBCA6B)
    u = (u ^ (u >> 13)) * jnp.uint32(0xC2B2AE35)
    u = u ^ (u >> 16)
    keep = u < jnp.uint32(_KEEP_THRESHOLD_U32)
    h = jnp.where(keep, h * KEEP_SCALE, 0.0)

    # ReLU (VPU), f32.
    h = jnp.maximum(h, 0.0)

    # fc2 as VPU mul + sublane (XLU) reduction (no degenerate N=1 MXU matmul).
    # Result is lane-dense (1, TB); b2 is a scalar read from SMEM.
    o_ref[...] = jnp.sum(h * w2_ref[...], axis=0, keepdims=True) + b2_ref[0]


def _choose_tile(B, In, H):
    """Pick the batch tile TB (lane dimension) and the grid size."""
    if B <= 512:
        # Single tile: block == full array dims, so no (8,128) divisibility
        # constraint, no ragged tile, no padding.
        return B, 1
    # Per-batch-column VMEM bytes: x tile double-buffered (bf16), out tile
    # double-buffered (f32, padded to 8 sublanes), ~4x (H, TB) f32 temporaries.
    per_col = 2 * In * 2 + 2 * 8 * 4 + 4 * H * 4
    # Fixed residents: w1 (bf16, assume double-buffered), b1, w2, slack.
    fixed = 2 * H * In * 2 + 4 * H * 4 + 4096
    budget = 20 * 2 ** 20
    tb_fit = max(_LANE, (budget - fixed) // per_col)
    tb = min(2048, (tb_fit // _LANE) * _LANE)
    # Keep at least 2 grid steps so ("parallel",) can shard across v7x's 2 TCs.
    half = -(-((B + 1) // 2) // _LANE) * _LANE
    tb = max(_LANE, min(tb, half))
    return tb, -(-B // tb)
    # TODO(synk): if H*In*2 approaches the VMEM budget, add an "arbitrary" K-reduction
    # grid axis instead of keeping w1 fully resident.


@functools.partial(jax.jit)
def value_net_forward(x, w1, b1, w2, b2, seed_arr):
    """x: (B, In). w1: (H, In), b1: (H,), w2: (1, H), b2: (1,) -- PyTorch nn.Linear
    parameter conventions. seed_arr: int32 array of shape (1,). Returns (B, 1) f32."""
    B, In = x.shape
    H = w1.shape[0]

    TB, num_tiles = _choose_tile(B, In, H)

    # Lane-dense x tiles (batch on lanes) + bf16 MXU operands (f32 accumulation).
    x_t = x.T.astype(jnp.bfloat16)          # (In, B)
    w1_b = w1.astype(jnp.bfloat16)          # (H, In)
    b1c = b1.reshape(H, 1).astype(jnp.float32)
    w2c = w2.reshape(H, 1).astype(jnp.float32)
    b2s = b2.reshape(1).astype(jnp.float32)  # SMEM scalar

    # Rough working-set estimate -> explicit scoped-VMEM limit (>= 32 MiB helps v5e's
    # 16 MiB default; stays well under v7x's 64 MiB physical VMEM).
    est = (2 * H * In * 2 + 2 * In * TB * 2 + 2 * 8 * TB * 4
           + 6 * H * TB * 4 + 4 * H * 4 + (1 << 16))
    vmem_limit = int(min(56 * 2 ** 20, max(32 * 2 ** 20, 2 * est)))

    cost = pl.CostEstimate(
        flops=2 * B * In * H + 8 * B * H,
        transcendentals=0,
        bytes_accessed=2 * B * In + 2 * H * In + 4 * (2 * H + 1) + 4 * B,
    )

    out = pl.pallas_call(
        value_net_kernel,
        out_shape=jax.ShapeDtypeStruct((1, B), jnp.float32),
        grid_spec=pltpu.PrefetchScalarGridSpec(
            num_scalar_prefetch=1,            # seed -> SMEM
            grid=(num_tiles,),
            in_specs=[
                pl.BlockSpec((In, TB), lambda i, s: (0, i)),   # x tile (pipelined, lane-dense)
                pl.BlockSpec((H, In), lambda i, s: (0, 0)),    # w1 resident in VMEM
                pl.BlockSpec((H, 1), lambda i, s: (0, 0)),     # b1 resident in VMEM
                pl.BlockSpec((H, 1), lambda i, s: (0, 0)),     # w2 resident in VMEM
                pl.BlockSpec(memory_space=pltpu.SMEM),         # b2 scalar in SMEM
            ],
            out_specs=pl.BlockSpec((1, TB), lambda i, s: (0, i)),  # lane-dense out
        ),
        compiler_params=pltpu.CompilerParams(
            dimension_semantics=("parallel",),
            vmem_limit_bytes=vmem_limit,
        ),
        cost_estimate=cost,
    )(seed_arr, x_t, w1_b, b1c, w2c, b2s)

    return out.reshape(B, 1)


if __name__ == "__main__":
    batch = 8
    input_size = 16
    hidden_size = 32

    key = jax.random.PRNGKey(0)
    kx, kw1, kb1, kw2, kb2 = jax.random.split(key, 5)

    # Deterministic inputs.
    x = jax.random.normal(kx, (batch, input_size), dtype=jnp.float32)

    # Deterministic parameter init mimicking PyTorch nn.Linear default
    # (uniform in [-1/sqrt(fan_in), 1/sqrt(fan_in)]).
    bound1 = 1.0 / (input_size ** 0.5)
    w1 = jax.random.uniform(kw1, (hidden_size, input_size),
                            minval=-bound1, maxval=bound1, dtype=jnp.float32)
    b1 = jax.random.uniform(kb1, (hidden_size,),
                            minval=-bound1, maxval=bound1, dtype=jnp.float32)

    bound2 = 1.0 / (hidden_size ** 0.5)
    w2 = jax.random.uniform(kw2, (1, hidden_size),
                            minval=-bound2, maxval=bound2, dtype=jnp.float32)
    b2 = jax.random.uniform(kb2, (1,),
                            minval=-bound2, maxval=bound2, dtype=jnp.float32)

    seed_arr = jnp.asarray([0], dtype=jnp.int32)

    out = value_net_forward(x, w1, b1, w2, b2, seed_arr)
    jax.block_until_ready(out)
    assert out.shape == (batch, 1) and out.dtype == jnp.float32
    assert bool(jnp.all(jnp.isfinite(out)))
    print("KERNEL_OK")
</pallas_src>

<mosaic_0001>
module attributes {stable_mosaic.version = 11 : i64} {
  func.func @value_net_kernel(%arg0: i32, %arg1: memref<1xi32, #tpu.memory_space<smem>>, %arg2: memref<16x8xbf16, #tpu.memory_space<vmem>>, %arg3: memref<32x16xbf16, #tpu.memory_space<vmem>>, %arg4: memref<32x1xf32, #tpu.memory_space<vmem>>, %arg5: memref<32x1xf32, #tpu.memory_space<vmem>>, %arg6: memref<1xf32, #tpu.memory_space<smem>>, %arg7: memref<1x8xf32, #tpu.memory_space<vmem>>) attributes {dimension_semantics = [#tpu.dimension_semantics<parallel>], iteration_bounds = array<i64: 1>, scalar_prefetch = 1 : i64, scratch_operands = 0 : i64, tpu.core_type = #tpu.core_type<tc>, window_params = [{transform_indices = @transform_0, window_bounds = array<i64: 16, 8>}, {pipeline_mode = #tpu.pipeline_mode<synchronous>, transform_indices = @transform_1, window_bounds = array<i64: 32, 16>}, {pipeline_mode = #tpu.pipeline_mode<synchronous>, transform_indices = @transform_2, window_bounds = array<i64: 32, 1>}, {pipeline_mode = #tpu.pipeline_mode<synchronous>, transform_indices = @transform_3, window_bounds = array<i64: 32, 1>}, {transform_indices = @transform_4, window_bounds = array<i64: 1>}, {transform_indices = @transform_5, window_bounds = array<i64: 1, 8>}]} {
    %c0 = arith.constant 0 : index
    %c0_0 = arith.constant 0 : index
    %0 = vector.load %arg3[%c0, %c0_0] : memref<32x16xbf16, #tpu.memory_space<vmem>>, vector<32x16xbf16>
    %c0_1 = arith.constant 0 : index
    %c0_2 = arith.constant 0 : index
    %1 = vector.load %arg2[%c0_1, %c0_2] : memref<16x8xbf16, #tpu.memory_space<vmem>>, vector<16x8xbf16>
    %cst = arith.constant dense<0.000000e+00> : vector<32x8xf32>
    %2 = tpu.matmul %0, %1, %cst {dimension_numbers = #tpu.dot_dimension_numbers<[1], [0], [0], [1], [0, 0, 1, 1], [], []>} : vector<32x16xbf16>, vector<16x8xbf16>, vector<32x8xf32> -> vector<32x8xf32>
    %c0_3 = arith.constant 0 : index
    %c0_4 = arith.constant 0 : index
    %3 = vector.load %arg4[%c0_3, %c0_4] : memref<32x1xf32, #tpu.memory_space<vmem>>, vector<32x1xf32>
    %4 = vector.broadcast %3 : vector<32x1xf32> to vector<32x8xf32>
    %5 = arith.addf %2, %4 : vector<32x8xf32>
    %6 = tpu.iota {dimensions = array<i32: 0>} : vector<32x8xi32>
    %7 = tpu.iota {dimensions = array<i32: 1>} : vector<32x8xi32>
    %c8_i32 = arith.constant 8 : i32
    %8 = arith.muli %arg0, %c8_i32 : i32
    %9 = vector.broadcast %8 : i32 to vector<32x8xi32>
    %10 = arith.addi %7, %9 : vector<32x8xi32>
    %c32_i32 = arith.constant 32 : i32
    %11 = vector.broadcast %c32_i32 : i32 to vector<32x8xi32>
    %12 = arith.muli %10, %11 : vector<32x8xi32>
    %13 = arith.addi %12, %6 : vector<32x8xi32>
    %c0_5 = arith.constant 0 : index
    %14 = memref.load %arg1[%c0_5] : memref<1xi32, #tpu.memory_space<smem>>
    %c-1640531527_i32 = arith.constant -1640531527 : i32
    %15 = arith.muli %14, %c-1640531527_i32 : i32
    %16 = vector.broadcast %15 : i32 to vector<32x8xi32>
    %17 = arith.addi %13, %16 : vector<32x8xi32>
    %c16_i32 = arith.constant 16 : i32
    %18 = vector.broadcast %c16_i32 : i32 to vector<32x8xi32>
    %19 = arith.shrui %17, %18 : vector<32x8xi32>
    %20 = arith.xori %17, %19 : vector<32x8xi32>
    %c-2048144789_i32 = arith.constant -2048144789 : i32
    %21 = vector.broadcast %c-2048144789_i32 : i32 to vector<32x8xi32>
    %22 = arith.muli %20, %21 : vector<32x8xi32>
    %c13_i32 = arith.constant 13 : i32
    %23 = vector.broadcast %c13_i32 : i32 to vector<32x8xi32>
    %24 = arith.shrui %22, %23 : vector<32x8xi32>
    %25 = arith.xori %22, %24 : vector<32x8xi32>
    %c-1028477387_i32 = arith.constant -1028477387 : i32
    %26 = vector.broadcast %c-1028477387_i32 : i32 to vector<32x8xi32>
    %27 = arith.muli %25, %26 : vector<32x8xi32>
    %c16_i32_6 = arith.constant 16 : i32
    %28 = vector.broadcast %c16_i32_6 : i32 to vector<32x8xi32>
    %29 = arith.shrui %27, %28 : vector<32x8xi32>
    %30 = arith.xori %27, %29 : vector<32x8xi32>
    %c858993459_i32 = arith.constant 858993459 : i32
    %31 = vector.broadcast %c858993459_i32 : i32 to vector<32x8xi32>
    %32 = arith.cmpi ult, %30, %31 : vector<32x8xi32>
    %cst_7 = arith.constant 5.000000e+00 : f32
    %33 = vector.broadcast %cst_7 : f32 to vector<32x8xf32>
    %34 = arith.mulf %5, %33 : vector<32x8xf32>
    %cst_8 = arith.constant 0.000000e+00 : f32
    %35 = vector.broadcast %cst_8 : f32 to vector<32x8xf32>
    %36 = arith.select %32, %34, %35 : vector<32x8xi1>, vector<32x8xf32>
    %cst_9 = arith.constant 0.000000e+00 : f32
    %37 = vector.broadcast %cst_9 : f32 to vector<32x8xf32>
    %38 = arith.maximumf %36, %37 : vector<32x8xf32>
    %c0_10 = arith.constant 0 : index
    %c0_11 = arith.constant 0 : index
    %39 = vector.load %arg5[%c0_10, %c0_11] : memref<32x1xf32, #tpu.memory_space<vmem>>, vector<32x1xf32>
    %40 = vector.broadcast %39 : vector<32x1xf32> to vector<32x8xf32>
    %41 = arith.mulf %38, %40 : vector<32x8xf32>
    %cst_12 = arith.constant dense<0.000000e+00> : vector<8xf32>
    %42 = vector.multi_reduction <add>, %41, %cst_12 [0] : vector<32x8xf32> to vector<8xf32>
    %43 = vector.shape_cast %42 : vector<8xf32> to vector<1x8xf32>
    %c0_13 = arith.constant 0 : index
    %44 = memref.load %arg6[%c0_13] : memref<1xf32, #tpu.memory_space<smem>>
    %45 = vector.broadcast %44 : f32 to vector<1x8xf32>
    %46 = arith.addf %43, %45 : vector<1x8xf32>
    %c0_14 = arith.constant 0 : index
    %c0_15 = arith.constant 0 : index
    %47 = vector.load %arg7[%c0_14, %c0_15] : memref<1x8xf32, #tpu.memory_space<vmem>>, vector<1x8xf32>
    tpu.vector_store %arg7[%c0_14, %c0_15], %46 {strides = array<i32>} : memref<1x8xf32, #tpu.memory_space<vmem>>, vector<1x8xf32>,
    return
  }
  func.func @transform_0(%arg0: i32, %arg1: memref<1xi32, #tpu.memory_space<smem>>) -> (i32, i32) {
    %c0_i32 = arith.constant 0 : i32
    %c0_i32_0 = arith.constant 0 : i32
    return %c0_i32, %arg0 : i32, i32
  }
  func.func @transform_1(%arg0: i32, %arg1: memref<1xi32, #tpu.memory_space<smem>>) -> (i32, i32) {
    %c0_i32 = arith.constant 0 : i32
    %c0_i32_0 = arith.constant 0 : i32
    %c0_i32_1 = arith.constant 0 : i32
    return %c0_i32, %c0_i32_0 : i32, i32
  }
  func.func @transform_2(%arg0: i32, %arg1: memref<1xi32, #tpu.memory_space<smem>>) -> (i32, i32) {
    %c0_i32 = arith.constant 0 : i32
    %c0_i32_0 = arith.constant 0 : i32
    %c0_i32_1 = arith.constant 0 : i32
    return %c0_i32, %c0_i32_0 : i32, i32
  }
  func.func @transform_3(%arg0: i32, %arg1: memref<1xi32, #tpu.memory_space<smem>>) -> (i32, i32) {
    %c0_i32 = arith.constant 0 : i32
    %c0_i32_0 = arith.constant 0 : i32
    %c0_i32_1 = arith.constant 0 : i32
    return %c0_i32, %c0_i32_0 : i32, i32
  }
  func.func @transform_4(%arg0: i32, %arg1: memref<1xi32, #tpu.memory_space<smem>>) -> i32 {
    %c0_i32 = arith.constant 0 : i32
    %c0_i32_0 = arith.constant 0 : i32
    return %c0_i32 : i32
  }
  func.func @transform_5(%arg0: i32, %arg1: memref<1xi32, #tpu.memory_space<smem>>) -> (i32, i32) {
    %c0_i32 = arith.constant 0 : i32
    %c0_i32_0 = arith.constant 0 : i32
    return %c0_i32, %arg0 : i32, i32
  }
}

</mosaic_0001>

<bundles_post_ra>
// kernel: value_net_forward.1
= control target key start
LH: loop header
LB: loop body
LE: loop exit
PB: predicated region body
PF: predicated region fallthrough
CT: control target
= control target key end

     0   :  { %vm71_vm0 = vcmask 130048   ;;  %v303_v3 = vmov 0   ;;  %s391_s0 = inlined_call_operand.<no memory space> [shape: s32[1], index: 0, kind: input, shape index: {}]   ;;  %s392_s1 = inlined_call_operand.vmem [shape: bf16[16,8], index: 1, kind: input, shape index: {}]   ;;  %s393_s2 = inlined_call_operand.vmem [shape: bf16[32,16], index: 2, kind: input, shape index: {}]   ;;  %s394_s3 = inlined_call_operand.vmem [shape: f32[32,1], index: 3, kind: input, shape index: {}]   ;;  %s395_s4 = inlined_call_operand.vmem [shape: f32[32,1], index: 4, kind: input, shape index: {}]   ;;  %s396_s5 = inlined_call_operand.<no memory space> [shape: f32[1], index: 5, kind: input, shape index: {}]   ;;  %s397_s6 = inlined_call_operand.hbm [shape: f32[1,8], index: 6, kind: output, shape index: {}]  }
   0x1   :  { %v276_v0 = vld [vmem:[%s392_s1] sm:$0xff]   ;;  %v278_v2 = vld [vmem:[%s393_s2 + $0x8] sm:$0xff]   ;;  %274 = vset.pattern.permute.xlu0 %v303_v3  ;;  %v33_v5 = vld [vmem:[%s394_s3 + $0x10] sm:$0xff]  ;;  %275 = vset.pattern.permute.xlu1 %v303_v3 }
   0x2   :  { %v277_v1 = vld [vmem:[%s393_s2] sm:$0xff]   ;;  %266 = vmatprep.subr.bf16.mxu0 %v276_v0  ;;  %47 = vperm.xlu1 %275, %v33_v5   ;;  %v32_v6 = vld [vmem:[%s394_s3 + $0x8] sm:$0xff] }
   0x3   :  { %267 = vmatpush3.bf16.msra.mxu0 %v276_v0  ;;  %268 = vmatprep.mubr.msk.bf16.mxu0 %vm71_vm0, %v277_v1  ;;  %v31_v4 = vld [vmem:[%s394_s3] sm:$0xff] }
   0x4   :  { %37 = vperm.xlu0 %274, %v31_v4  }
   0x5   :  { %13 = vsyncpa [#allocation6], 0  ;;  %v34_v7 = vld [vmem:[%s394_s3 + $0x18] sm:$0xff]  ;;  %v197_v8 = vld [vmem:[%s395_s4] sm:$0xff]  ;;  %v127_v12 = vlaneseq  ;;  %s143_s18 = smul.u32 2654435769, %s391_s0 }
   0x6   :  { %269 = vmatmul.mubr.msk.bf16.vlgmr.msra.gmra.mrb[0].mxu0 %vm71_vm0, %v278_v2  ;;  %52 = vperm.xlu1 %275, %v34_v7   ;;  %v198_v9 = vld [vmem:[%s395_s4 + $0x8] sm:$0xff]  ;;  %v199_v10 = vld [vmem:[%s395_s4 + $0x10] sm:$0xff]  ;;  %v200_v11 = vld [vmem:[%s395_s4 + $0x18] sm:$0xff]  ;;  %vm225_vm5 = vcmask 64512   ;;  %s304_s19 = smov [#allocation5]   ;;  %vm242_vm6 = vcmask 57344  }
   0x7   :  { %v128_v13 = vshrl.u32 %v127_v12, 7  ;;  %v133_v14 = vand.u32 127, %v127_v12  ;;  %v144_v20 = vstv %s143_s18  ;;  %s250_s20 = sshll.u32 %s304_s19, 4  ;;  %s251_s20 = int_to_ptr.vmem [resolvable:$true] %s250_s20 }
   0x8   :  { %42 = vperm.xlu0 %274, %v32_v6   ;;  %s279_s21 = scalar_lea.vmem %s251_s20, 16  ;;  %s283_s22 = scalar_lea.vmem %s251_s20, 32 }
   0x9   :  { %v130_v15 = vadd.s32 16, %v128_v13  ;;  %v137_v16 = vmul.u32 32, %v133_v14  ;;  %v131_v17 = vadd.s32 24, %v128_v13  ;;  %v129_v18 = vadd.s32 8, %v128_v13  ;;  %p280_p0 = scmp.ne.s32.totalorder %s251_s20, %s279_s21  ;;  %p284_p1 = scmp.lt.s32.totalorder %s251_s20, %s251_s20 }
   0xa   :  { %208 = vperm.xlu1 %275, %v198_v9   ;;  %p285_p2 = scmp.lt.s32.totalorder %s283_s22, %s279_s21 }
   0xb   :  { %v140_v19 = vadd.s32 %v137_v16, %v130_v15  ;;  %v138_v21 = vadd.s32 %v137_v16, %v128_v13  ;;  %v141_v22 = vadd.s32 %v137_v16, %v131_v17  ;;  %v139_v23 = vadd.s32 %v137_v16, %v129_v18 }
   0xc   :  { %203 = vperm.xlu0 %274, %v197_v8   ;;  %p286_p3 = por %p285_p2, %p284_p1 }
   0xd   :  { %v147_v24 = vadd.s32 %v144_v20, %v140_v19  ;;  %v145_v25 = vadd.s32 %v144_v20, %v138_v21  ;;  %v148_v26 = vadd.s32 %v144_v20, %v141_v22  ;;  %v146_v27 = vadd.s32 %v144_v20, %v139_v23 }
   0xe   :  { %218 = vperm.xlu1 %275, %v200_v11   ;;  %p287_p4 = pnand %p286_p3, %p280_p0 }
   0xf   :  { %v151_v28 = vshrl.u32 %v147_v24, 16  ;;  %v149_v29 = vshrl.u32 %v145_v25, 16  ;;  %v152_v30 = vshrl.u32 %v148_v26, 16  ;;  %v150_v31 = vshrl.u32 %v146_v27, 16 }
  0x10   :  { %213 = vperm.xlu0 %274, %v199_v10  }
  0x11   :  { %v155_v32 = vxor.u32 %v151_v28, %v147_v24  ;;  %v153_v33 = vxor.u32 %v149_v29, %v145_v25  ;;  %v156_v34 = vxor.u32 %v152_v30, %v148_v26  ;;  %v154_v35 = vxor.u32 %v150_v31, %v146_v27 }
  0x13   :  { %v159_v36 = vmul.u32 2246822507, %v155_v32  ;;  %v157_v37 = vmul.u32 2246822507, %v153_v33 }
  0x14   :  { %v160_v38 = vmul.u32 2246822507, %v156_v34  ;;  %v158_v39 = vmul.u32 2246822507, %v154_v35 }
  0x15   :  { %v163_v40 = vshrl.u32 %v159_v36, 13  ;;  %v161_v41 = vshrl.u32 %v157_v37, 13 }
  0x16   :  { %v164_v42 = vshrl.u32 %v160_v38, 13  ;;  %v162_v43 = vshrl.u32 %v158_v39, 13 }
  0x17   :  { %v167_v44 = vxor.u32 %v163_v40, %v159_v36  ;;  %v165_v45 = vxor.u32 %v161_v41, %v157_v37  ;;  %v240_v40 = vstv %s396_s5 }
  0x18   :  { %v168_v46 = vxor.u32 %v164_v42, %v160_v38  ;;  %v166_v47 = vxor.u32 %v162_v43, %v158_v39 }
  0x19   :  { %v171_v48 = vmul.u32 3266489909, %v167_v44  ;;  %v169_v49 = vmul.u32 3266489909, %v165_v45 }
  0x1a   :  { %v172_v51 = vmul.u32 3266489909, %v168_v46  ;;  %v170_v52 = vmul.u32 3266489909, %v166_v47 }
  0x1b   :  { %v175_v54 = vshrl.u32 %v171_v48, 16  ;;  %v173_v55 = vshrl.u32 %v169_v49, 16 }
  0x1c   :  { %v176_v56 = vshrl.u32 %v172_v51, 16  ;;  %v174_v57 = vshrl.u32 %v170_v52, 16 }
  0x1d   :  { %v179_v59 = vxor.u32 %v175_v54, %v171_v48  ;;  %v177_v60 = vxor.u32 %v173_v55, %v169_v49 }
  0x1e   :  { %v180_v63 = vxor.u32 %v176_v56, %v172_v51  ;;  %v178_v2 = vxor.u32 %v174_v57, %v170_v52 }
  0x1f   :  { %vm183_vm1 = vcmp.lt.u32.totalorder %v179_v59, 858993459  ;;  %vm181_vm2 = vcmp.lt.u32.totalorder %v177_v60, 858993459 }
  0x20   :  { %vm184_vm3 = vcmp.lt.u32.totalorder %v180_v63, 858993459  ;;  %vm182_vm4 = vcmp.lt.u32.totalorder %v178_v2, 858993459 }
  0x81   :  { %v48_v53 = vpop.permute.xlu1 %47 }
  0x83   :  { %v38_v50 = vpop.permute.xlu0 %37 }
  0x85   :  { %v53_v61 = vpop.permute.xlu1 %52 }
  0x87   :  { %v43_v58 = vpop.permute.xlu0 %42 }
  0x89   :  { %v209_v13 = vpop.permute.xlu1 %208 }
  0x8b   :  { %v204_v8 = vpop.permute.xlu0 %203 }
  0x8d   :  { %v219_v26 = vpop.permute.xlu1 %218 }
  0x8f   :  { %v214_v23 = vpop.permute.xlu0 %213 }
  0xd9   :  { %v270_v62 = vpop.f32.mrb[0].mxu0 }
  0xda   :  { %v121_v0 = vadd.f32 %v270_v62, %v48_v53  ;;  %v112_v1 = vpop.f32.mrb[1].mxu0 }
  0xdb   :  { %v113_v3 = vadd.f32 %v112_v1, %v38_v50  ;;  %v271_v4 = vpop.f32.mrb[2].mxu0 }
  0xdc   :  { %v187_v5 = vmul.f32 5.0, %v121_v0  ;;  %v124_v6 = vadd.f32 %v271_v4, %v53_v61  ;;  %v115_v7 = vpop.f32.mrb[3].mxu0 }
  0xdd   :  { %v185_v9 = vmul.f32 5.0, %v113_v3  ;;  %v116_v10 = vadd.f32 %v115_v7, %v43_v58 }
  0xde   :  { %v191_v11 = vsel %vm183_vm1, %v187_v5, 0.0  ;;  %v188_v12 = vmul.f32 5.0, %v124_v6 }
  0xdf   :  { %v189_v14 = vsel %vm181_vm2, %v185_v9, 0.0  ;;  %v186_v15 = vmul.f32 5.0, %v116_v10  ;;  %v195_v16 = vmax.f32 %v191_v11, 0.0 }
  0xe0   :  { %v193_v17 = vmax.f32 %v189_v14, 0.0  ;;  %v192_v18 = vsel %vm184_vm3, %v188_v12, 0.0 }
  0xe1   :  { %v190_v19 = vsel %vm182_vm4, %v186_v15, 0.0  ;;  %v196_v21 = vmax.f32 %v192_v18, 0.0  ;;  %v223_v24 = vmul.f32 %v214_v23, %v195_v16 }
  0xe2   :  { %v221_v20 = vmul.f32 %v204_v8, %v193_v17  ;;  %v194_v22 = vmax.f32 %v190_v19, 0.0 }
  0xe3   :  { %v224_v28 = vmul.f32 %v219_v26, %v196_v21  ;;  %v229_v31 = vsel %vm225_vm5, %v223_v24, 0.0 }
  0xe4   :  { %v222_v25 = vmul.f32 %v209_v13, %v194_v22  ;;  %v226_v27 = vsel %vm225_vm5, %v221_v20, 0.0 }
  0xe5   :  { %v231_v33 = vsel %vm225_vm5, %v224_v28, 0.0 }
  0xe6   :  { %v227_v29 = vsel %vm225_vm5, %v222_v25, 0.0 }
  0xe7   :  { %v228_v30 = vadd.f32 %v227_v29, %v226_v27 }
  0xe9   :  { %v230_v32 = vadd.f32 %v229_v31, %v228_v30 }
  0xeb   :  { %v232_v34 = vadd.f32 %v231_v33, %v230_v32 }
  0xed   :  { %v233_v35 = vrot.slane %v232_v34, 4 }
  0xef   :  { %v234_v36 = vadd.f32 %v233_v35, %v232_v34 }
  0xf1   :  { %v235_v37 = vrot.slane %v234_v36, 2 }
  0xf3   :  { %v236_v38 = vadd.f32 %v235_v37, %v234_v36 }
  0xf5   :  { %v237_v39 = vrot.slane %v236_v38, 1 }
  0xf7   :  { %v238_v41 = vadd.f32 %v237_v39, %v236_v38 }
  0xf9   :  { %v241_v42 = vadd.f32 %v240_v40, %v238_v41 }
  0xfb   :  { %243 = vst.msk [vmem:[#allocation5] sm:$0x1] %vm242_vm6, %v241_v42 }
  0xfc   :  { %290 = shalt.err (!%p287_p4)
}
  0xfd   :  { %s291_s25 = scalar_lea.hbm %s397_s6, 16 }
  0xfe   :  { %p292_p5 = scmp.ne.s32.totalorder %s397_s6, %s291_s25  ;;  %p295_p6 = scmp.lt.u32.totalorder %s291_s25, %s397_s6 }
 0x100   :  { %p297_p7 = pnand %p295_p6, %p292_p5 }
 0x102   :  { %300 = shalt.err (!%p297_p7)
}
 0x103   :  { %253 = dma.vmem_to_hbm [thread:$0]  %s251_s20, 16, %s397_s6, [#allocation6]  }
 0x104   :  { %301 = dma.done.wait [#allocation6], 16  }
 0x105   :  { %302 = vsyncadd [#allocation6], 4294967280 }
 0x106   :  { %257 = vsyncpa [#allocation6], 1 }

</bundles_post_ra>
